<compile_context>
chip_gen: v6e
topology: v6e:2x2x1
jax: 0.10.0
libtpu: 0.0.40
codegen_flags: <defaults>
</compile_context>

<pallas_src>
import jax
import jax.numpy as jnp
from jax.experimental import pallas as pl
from jax.experimental.pallas import tpu as pltpu

BN_EPS = 1e-5          # nn.BatchNorm2d default eps
LEAKY_SLOPE = 0.01     # nn.LeakyReLU default negative_slope


# --------------------------------------------------------------------------
# Shared helper: 1x1 conv as Cin broadcast-FMAs on the VPU (guard against
# MXU refactors — a degenerate (Cout=8, Cin=4) matmul is a regression).
# --------------------------------------------------------------------------
def _conv1x1_vpu(w, x, init=None):
    """y[co, t] = init[co] + sum_ci w[co, ci] * x[ci, t].

    w: (Cout, Cin) f32, x: (Cin, T) f32, init: None or (Cout, 1) f32.
    Cin is tiny and static, so the Python loop fully unrolls.
    """
    cin = w.shape[1]
    y = w[:, 0:1] * x[0:1, :]
    if init is not None:
        y = y + init
    for ci in range(1, cin):
        y = y + w[:, ci:ci + 1] * x[ci:ci + 1, :]
    return y


def _leaky(y):
    # slope < 1 so max(y, slope*y) == LeakyReLU(y); one mul + one max.
    return jnp.maximum(y, LEAKY_SLOPE * y)


# --------------------------------------------------------------------------
# Fused single-call path (whole problem VMEM-resident).
# --------------------------------------------------------------------------
def fused_kernel(x_ref, w_ref, gamma_ref, beta_ref, o_ref):
    """x_ref: (N, Cin, HW), w_ref: (Cout, Cin), gamma/beta: (Cout, 1),
    o_ref: (N, Cout, HW).  o_ref doubles as VMEM scratch for z = W @ x, so
    x is read from HBM once and the output written once.
    """
    n_img = x_ref.shape[0]
    cout = w_ref.shape[0]
    hw = x_ref.shape[2]
    inv_cnt = 1.0 / float(n_img * hw)
    w = w_ref[...]

    # Pass A: conv, stash z in o_ref, accumulate per-channel sums.
    zsum = jnp.zeros((cout, 1), jnp.float32)
    for n in range(n_img):
        z = _conv1x1_vpu(w, x_ref[n])
        o_ref[n] = z
        zsum = zsum + jnp.sum(z, axis=1, keepdims=True)
    mean = zsum * inv_cnt

    # Pass B: exact centered batch variance (all VMEM traffic).
    vsum = jnp.zeros((cout, 1), jnp.float32)
    for n in range(n_img):
        d = o_ref[n] - mean
        vsum = vsum + jnp.sum(d * d, axis=1, keepdims=True)
    var = vsum * inv_cnt

    scale = gamma_ref[...] * jax.lax.rsqrt(var + BN_EPS)   # (Cout, 1)
    shift = beta_ref[...] - mean * scale

    # Pass C: affine + LeakyReLU, lane-dense store.
    for n in range(n_img):
        y = o_ref[n] * scale + shift
        o_ref[n] = _leaky(y).astype(o_ref.dtype)


# --------------------------------------------------------------------------
# Two-pass tiled path (arbitrarily large H*W / N).
# --------------------------------------------------------------------------
def moments_kernel(x_ref, m_ref):
    """Pass 1: accumulate per-(split, image) moments of x.

    x_ref: (1, Cin, T)            one pixel tile of one image
    m_ref: (Cin+1, 1, Cin, 1)     slab 0     -> sum_t x[ci, t]
                                  slab cj+1  -> sum_t x[ci, t] * x[cj, t]
    The conv weight never enters this kernel (moments of x, not of z).
    """
    @pl.when(pl.program_id(2) == 0)
    def _():
        m_ref[...] = jnp.zeros_like(m_ref)

    x = x_ref[0]                                  # (Cin, T) f32
    cin = x.shape[0]
    m_ref[0] += jnp.sum(x, axis=1, keepdims=True)[None]           # (1, Cin, 1)
    for cj in range(cin):
        m_ref[cj + 1] += jnp.sum(x * x[cj:cj + 1, :], axis=1,
                                 keepdims=True)[None]


def apply_kernel(x_ref, ws_ref, shift_ref, o_ref):
    """Pass 2: out = LeakyReLU((scale*W) @ x + shift), lane-dense store.

    x_ref: (1, Cin, T), ws_ref: (Cout, Cin) BN-scaled weight,
    shift_ref: (Cout, 1) fused BN shift, o_ref: (1, Cout, T).
    """
    y = _conv1x1_vpu(ws_ref[...], x_ref[0], init=shift_ref[...])
    o_ref[0] = _leaky(y).astype(o_ref.dtype)


# --------------------------------------------------------------------------
# Wrapper
# --------------------------------------------------------------------------
def _pick_tile(hw, max_tile=32768):
    """Largest 128-aligned pixel tile dividing H*W (capped at max_tile).

    Big tiles amortize the ~0.35 us per-grid-step overhead; even at 32768 the
    double-buffered blocks are only a few MiB (fine on v5e/v6e/v7x).
    """
    if hw % 128 != 0:
        return hw                     # full-extent block (masked vld/vst)
    for t in (32768, 16384, 8192, 4096, 2048, 1024, 512, 256, 128):
        if t <= max_tile and t <= hw and hw % t == 0:
            return t
    return hw


def _fused_fits(n, cin, cout, hw):
    # x + out resident in VMEM, with headroom for in-kernel intermediates.
    # 12 MiB keeps us well under v7x's 32 MiB default scoped limit; N capped
    # to bound the static unroll in the fused kernel.
    return n <= 16 and 4 * n * hw * (cin + cout) <= (12 << 20)


def from_rgb_forward(x_nchw, conv_w, conv_b, bn_gamma, bn_beta,
                     *, force_two_pass=False, max_tile=32768):
    """x_nchw: (N, Cin, H, W) f32 -> (N, Cout, H, W) f32 (train-mode BN)."""
    del conv_b  # cancels exactly under training-mode BatchNorm (mean subtract)
    N, Cin, H, W = x_nchw.shape
    Cout = conv_w.shape[0]
    HW = H * W

    x3d = x_nchw.reshape(N, Cin, HW)          # free reshape, no transpose
    w2d = conv_w.reshape(Cout, Cin)           # (Cout, Cin)

    # ---------------- Fused VMEM-resident fast path ------------------------
    if not force_two_pass and _fused_fits(N, Cin, Cout, HW):
        out3d = pl.pallas_call(
            fused_kernel,
            out_shape=jax.ShapeDtypeStruct((N, Cout, HW), jnp.float32),
        )(x3d, w2d, bn_gamma.reshape(Cout, 1), bn_beta.reshape(Cout, 1))
        return out3d.reshape(N, Cout, H, W)

    # ---------------- Two-pass tiled path -----------------------------------
    T = _pick_tile(HW, max_tile)
    n_tiles = HW // T
    # Extra parallel split of the tile axis so both v7x TensorCores get work
    # in pass 1 even when N is small.
    n_split = 2 if (n_tiles >= 2 and n_tiles % 2 == 0) else 1
    tiles_per = n_tiles // n_split

    # ---- Pass 1: per-(split, image) moments of x (sum_x + Gram) -----------
    partials = pl.pallas_call(
        moments_kernel,
        out_shape=jax.ShapeDtypeStruct((Cin + 1, n_split * N, Cin, 1),
                                       jnp.float32),
        grid=(n_split, N, tiles_per),
        in_specs=[
            pl.BlockSpec((1, Cin, T),
                         lambda s, n, t: (n, 0, s * tiles_per + t)),
        ],
        out_specs=pl.BlockSpec((Cin + 1, 1, Cin, 1),
                               lambda s, n, t: (0, s * N + n, 0, 0)),
        compiler_params=pltpu.CompilerParams(
            dimension_semantics=("parallel", "parallel", "arbitrary")),
    )(x3d)

    # ---- Fuse BN constants (tiny per-channel math in plain JAX) -----------
    cnt = jnp.float32(N * HW)
    moments = jnp.sum(partials, axis=1)[..., 0]        # (Cin+1, Cin)
    sum_x = moments[0]                                  # (Cin,)
    gram = moments[1:]                                  # (Cin, Cin), sym.
    mean_x = sum_x / cnt
    # NOTE: uncentered second moment -> cancellation risk for |mean| >> std;
    # acceptable for this module's 0.02-scale weights.  The fused fast path
    # above uses exact centered variance.
    cov_x = gram / cnt - jnp.outer(mean_x, mean_x)      # (Cin, Cin)
    mean_z = w2d @ mean_x                               # (Cout,)
    var_z = jnp.maximum(jnp.einsum('oi,ij,oj->o', w2d, cov_x, w2d), 0.0)
    scale = bn_gamma * jax.lax.rsqrt(var_z + BN_EPS)    # (Cout,)
    shift = bn_beta - mean_z * scale                    # (Cout,)
    ws = w2d * scale[:, None]                           # fold BN scale into W

    # ---- Pass 2: conv (recomputed) + fused BN + LeakyReLU ------------------
    out3d = pl.pallas_call(
        apply_kernel,
        out_shape=jax.ShapeDtypeStruct((N, Cout, HW), jnp.float32),
        grid=(N, n_tiles),
        in_specs=[
            pl.BlockSpec((1, Cin, T), lambda n, t: (n, 0, t)),
            pl.BlockSpec((Cout, Cin), lambda n, t: (0, 0)),
            pl.BlockSpec((Cout, 1), lambda n, t: (0, 0)),
        ],
        out_specs=pl.BlockSpec((1, Cout, T), lambda n, t: (n, 0, t)),
        compiler_params=pltpu.CompilerParams(
            dimension_semantics=("parallel", "parallel")),
    )(x3d, ws, shift.reshape(Cout, 1))

    return out3d.reshape(N, Cout, H, W)


# --------------------------------------------------------------------------
# Pure-JAX reference mirroring the PyTorch module (train-mode BatchNorm).
# --------------------------------------------------------------------------
def reference_forward(x, conv_w, conv_b, bn_gamma, bn_beta):
    Cout, Cin = conv_w.shape[0], conv_w.shape[1]
    w = conv_w.reshape(Cout, Cin)
    y = jnp.einsum('oc,nchw->nohw', w, x) + conv_b[None, :, None, None]
    mean = jnp.mean(y, axis=(0, 2, 3), keepdims=True)
    var = jnp.mean((y - mean) ** 2, axis=(0, 2, 3), keepdims=True)
    yn = (y - mean) * jax.lax.rsqrt(var + BN_EPS)
    yn = yn * bn_gamma[None, :, None, None] + bn_beta[None, :, None, None]
    return jnp.where(yn >= 0, yn, LEAKY_SLOPE * yn)


if __name__ == "__main__":
    key = jax.random.PRNGKey(0)
    k_x, k_w, k_b, k_g, k_x2 = jax.random.split(key, 5)

    # Shapes consistent with FromRGB(in_channels=4, out_channels=8).
    N, Cin, Cout, H, W = 2, 4, 8, 16, 16
    x = jax.random.normal(k_x, (N, Cin, H, W), dtype=jnp.float32)

    # Conv2d weight ~ N(0, 0.02) (module init loop); bias: PyTorch default
    # uniform(-1/sqrt(fan_in), 1/sqrt(fan_in)).
    conv_w = 0.02 * jax.random.normal(k_w, (Cout, Cin, 1, 1), dtype=jnp.float32)
    bound = 1.0 / jnp.sqrt(jnp.float32(Cin))
    conv_b = jax.random.uniform(k_b, (Cout,), dtype=jnp.float32,
                                minval=-bound, maxval=bound)
    # BatchNorm2d: weight ~ N(0, 0.02), bias = 0 (module init loop).
    bn_gamma = 0.02 * jax.random.normal(k_g, (Cout,), dtype=jnp.float32)
    bn_beta = jnp.zeros((Cout,), dtype=jnp.float32)

    # 1) Fused VMEM-resident fast path (the path real FromRGB shapes hit).
    ref = reference_forward(x, conv_w, conv_b, bn_gamma, bn_beta)
    out = jax.block_until_ready(
        from_rgb_forward(x, conv_w, conv_b, bn_gamma, bn_beta))
    assert out.shape == (N, Cout, H, W)
    assert jnp.allclose(out, ref, atol=1e-5, rtol=1e-5), "fused path mismatch"

    # 2) Two-pass tiled path, forced with a tiny tile so the multi-tile
    #    accumulation and the 2-way megacore split are exercised too.
    H2 = W2 = 32
    x2 = jax.random.normal(k_x2, (N, Cin, H2, W2), dtype=jnp.float32)
    ref2 = reference_forward(x2, conv_w, conv_b, bn_gamma, bn_beta)
    out2 = jax.block_until_ready(
        from_rgb_forward(x2, conv_w, conv_b, bn_gamma, bn_beta,
                         force_two_pass=True, max_tile=128))
    assert out2.shape == (N, Cout, H2, W2)
    assert jnp.allclose(out2, ref2, atol=1e-5, rtol=1e-5), "tiled path mismatch"

    print("KERNEL_OK")
</pallas_src>

<mosaic_0001>
module attributes {stable_mosaic.version = 11 : i64} {
  func.func @fused_kernel(%arg0: memref<2x4x256xf32, #tpu.memory_space<vmem>>, %arg1: memref<8x4xf32, #tpu.memory_space<vmem>>, %arg2: memref<8x1xf32, #tpu.memory_space<vmem>>, %arg3: memref<8x1xf32, #tpu.memory_space<vmem>>, %arg4: memref<2x8x256xf32, #tpu.memory_space<vmem>>) attributes {dimension_semantics = [], scalar_prefetch = 0 : i64, scratch_operands = 0 : i64, tpu.core_type = #tpu.core_type<tc>} {
    %c0 = arith.constant 0 : index
    %c0_0 = arith.constant 0 : index
    %0 = vector.load %arg1[%c0, %c0_0] : memref<8x4xf32, #tpu.memory_space<vmem>>, vector<8x4xf32>
    %cst = arith.constant 0.000000e+00 : f32
    %1 = vector.broadcast %cst : f32 to vector<8x1xf32>
    %c0_1 = arith.constant 0 : index
    %c0_2 = arith.constant 0 : index
    %c0_3 = arith.constant 0 : index
    %2 = vector.load %arg0[%c0_1, %c0_2, %c0_3] : memref<2x4x256xf32, #tpu.memory_space<vmem>>, vector<1x4x256xf32>
    %3 = vector.shape_cast %2 : vector<1x4x256xf32> to vector<4x256xf32>
    %4 = vector.extract_strided_slice %0 {offsets = [0, 0], sizes = [8, 1], strides = [1, 1]} : vector<8x4xf32> to vector<8x1xf32>
    %5 = vector.extract_strided_slice %3 {offsets = [0, 0], sizes = [1, 256], strides = [1, 1]} : vector<4x256xf32> to vector<1x256xf32>
    %6 = vector.broadcast %4 : vector<8x1xf32> to vector<8x256xf32>
    %7 = vector.broadcast %5 : vector<1x256xf32> to vector<8x256xf32>
    %8 = arith.mulf %6, %7 : vector<8x256xf32>
    %9 = vector.extract_strided_slice %0 {offsets = [0, 1], sizes = [8, 1], strides = [1, 1]} : vector<8x4xf32> to vector<8x1xf32>
    %10 = vector.extract_strided_slice %3 {offsets = [1, 0], sizes = [1, 256], strides = [1, 1]} : vector<4x256xf32> to vector<1x256xf32>
    %11 = vector.broadcast %9 : vector<8x1xf32> to vector<8x256xf32>
    %12 = vector.broadcast %10 : vector<1x256xf32> to vector<8x256xf32>
    %13 = arith.mulf %11, %12 : vector<8x256xf32>
    %14 = arith.addf %8, %13 : vector<8x256xf32>
    %15 = vector.extract_strided_slice %0 {offsets = [0, 2], sizes = [8, 1], strides = [1, 1]} : vector<8x4xf32> to vector<8x1xf32>
    %16 = vector.extract_strided_slice %3 {offsets = [2, 0], sizes = [1, 256], strides = [1, 1]} : vector<4x256xf32> to vector<1x256xf32>
    %17 = vector.broadcast %15 : vector<8x1xf32> to vector<8x256xf32>
    %18 = vector.broadcast %16 : vector<1x256xf32> to vector<8x256xf32>
    %19 = arith.mulf %17, %18 : vector<8x256xf32>
    %20 = arith.addf %14, %19 : vector<8x256xf32>
    %21 = vector.extract_strided_slice %0 {offsets = [0, 3], sizes = [8, 1], strides = [1, 1]} : vector<8x4xf32> to vector<8x1xf32>
    %22 = vector.extract_strided_slice %3 {offsets = [3, 0], sizes = [1, 256], strides = [1, 1]} : vector<4x256xf32> to vector<1x256xf32>
    %23 = vector.broadcast %21 : vector<8x1xf32> to vector<8x256xf32>
    %24 = vector.broadcast %22 : vector<1x256xf32> to vector<8x256xf32>
    %25 = arith.mulf %23, %24 : vector<8x256xf32>
    %26 = arith.addf %20, %25 : vector<8x256xf32>
    %c0_4 = arith.constant 0 : index
    %c0_5 = arith.constant 0 : index
    %c0_6 = arith.constant 0 : index
    %27 = vector.load %arg4[%c0_4, %c0_5, %c0_6] : memref<2x8x256xf32, #tpu.memory_space<vmem>>, vector<1x8x256xf32>
    %28 = vector.shape_cast %27 : vector<1x8x256xf32> to vector<8x256xf32>
    %29 = vector.shape_cast %26 : vector<8x256xf32> to vector<1x8x256xf32>
    tpu.vector_store %arg4[%c0_4, %c0_5, %c0_6], %29 {strides = array<i32>} : memref<2x8x256xf32, #tpu.memory_space<vmem>>, vector<1x8x256xf32>,
    %cst_7 = arith.constant dense<0.000000e+00> : vector<8xf32>
    %30 = vector.multi_reduction <add>, %26, %cst_7 [1] : vector<8x256xf32> to vector<8xf32>
    %31 = vector.shape_cast %30 : vector<8xf32> to vector<8x1xf32>
    %32 = arith.addf %1, %31 : vector<8x1xf32>
    %c1 = arith.constant 1 : index
    %c0_8 = arith.constant 0 : index
    %c0_9 = arith.constant 0 : index
    %33 = vector.load %arg0[%c1, %c0_8, %c0_9] : memref<2x4x256xf32, #tpu.memory_space<vmem>>, vector<1x4x256xf32>
    %34 = vector.shape_cast %33 : vector<1x4x256xf32> to vector<4x256xf32>
    %35 = vector.extract_strided_slice %0 {offsets = [0, 0], sizes = [8, 1], strides = [1, 1]} : vector<8x4xf32> to vector<8x1xf32>
    %36 = vector.extract_strided_slice %34 {offsets = [0, 0], sizes = [1, 256], strides = [1, 1]} : vector<4x256xf32> to vector<1x256xf32>
    %37 = vector.broadcast %35 : vector<8x1xf32> to vector<8x256xf32>
    %38 = vector.broadcast %36 : vector<1x256xf32> to vector<8x256xf32>
    %39 = arith.mulf %37, %38 : vector<8x256xf32>
    %40 = vector.extract_strided_slice %0 {offsets = [0, 1], sizes = [8, 1], strides = [1, 1]} : vector<8x4xf32> to vector<8x1xf32>
    %41 = vector.extract_strided_slice %34 {offsets = [1, 0], sizes = [1, 256], strides = [1, 1]} : vector<4x256xf32> to vector<1x256xf32>
    %42 = vector.broadcast %40 : vector<8x1xf32> to vector<8x256xf32>
    %43 = vector.broadcast %41 : vector<1x256xf32> to vector<8x256xf32>
    %44 = arith.mulf %42, %43 : vector<8x256xf32>
    %45 = arith.addf %39, %44 : vector<8x256xf32>
    %46 = vector.extract_strided_slice %0 {offsets = [0, 2], sizes = [8, 1], strides = [1, 1]} : vector<8x4xf32> to vector<8x1xf32>
    %47 = vector.extract_strided_slice %34 {offsets = [2, 0], sizes = [1, 256], strides = [1, 1]} : vector<4x256xf32> to vector<1x256xf32>
    %48 = vector.broadcast %46 : vector<8x1xf32> to vector<8x256xf32>
    %49 = vector.broadcast %47 : vector<1x256xf32> to vector<8x256xf32>
    %50 = arith.mulf %48, %49 : vector<8x256xf32>
    %51 = arith.addf %45, %50 : vector<8x256xf32>
    %52 = vector.extract_strided_slice %0 {offsets = [0, 3], sizes = [8, 1], strides = [1, 1]} : vector<8x4xf32> to vector<8x1xf32>
    %53 = vector.extract_strided_slice %34 {offsets = [3, 0], sizes = [1, 256], strides = [1, 1]} : vector<4x256xf32> to vector<1x256xf32>
    %54 = vector.broadcast %52 : vector<8x1xf32> to vector<8x256xf32>
    %55 = vector.broadcast %53 : vector<1x256xf32> to vector<8x256xf32>
    %56 = arith.mulf %54, %55 : vector<8x256xf32>
    %57 = arith.addf %51, %56 : vector<8x256xf32>
    %c1_10 = arith.constant 1 : index
    %c0_11 = arith.constant 0 : index
    %c0_12 = arith.constant 0 : index
    %58 = vector.load %arg4[%c1_10, %c0_11, %c0_12] : memref<2x8x256xf32, #tpu.memory_space<vmem>>, vector<1x8x256xf32>
    %59 = vector.shape_cast %58 : vector<1x8x256xf32> to vector<8x256xf32>
    %60 = vector.shape_cast %57 : vector<8x256xf32> to vector<1x8x256xf32>
    tpu.vector_store %arg4[%c1_10, %c0_11, %c0_12], %60 {strides = array<i32>} : memref<2x8x256xf32, #tpu.memory_space<vmem>>, vector<1x8x256xf32>,
    %cst_13 = arith.constant dense<0.000000e+00> : vector<8xf32>
    %61 = vector.multi_reduction <add>, %57, %cst_13 [1] : vector<8x256xf32> to vector<8xf32>
    %62 = vector.shape_cast %61 : vector<8xf32> to vector<8x1xf32>
    %63 = arith.addf %32, %62 : vector<8x1xf32>
    %cst_14 = arith.constant 0.001953125 : f32
    %64 = vector.broadcast %cst_14 : f32 to vector<8x1xf32>
    %65 = arith.mulf %63, %64 : vector<8x1xf32>
    %cst_15 = arith.constant 0.000000e+00 : f32
    %66 = vector.broadcast %cst_15 : f32 to vector<8x1xf32>
    %c0_16 = arith.constant 0 : index
    %c0_17 = arith.constant 0 : index
    %c0_18 = arith.constant 0 : index
    %67 = vector.load %arg4[%c0_16, %c0_17, %c0_18] : memref<2x8x256xf32, #tpu.memory_space<vmem>>, vector<1x8x256xf32>
    %68 = vector.shape_cast %67 : vector<1x8x256xf32> to vector<8x256xf32>
    %69 = vector.broadcast %65 : vector<8x1xf32> to vector<8x256xf32>
    %70 = arith.subf %68, %69 : vector<8x256xf32>
    %71 = arith.mulf %70, %70 : vector<8x256xf32>
    %cst_19 = arith.constant dense<0.000000e+00> : vector<8xf32>
    %72 = vector.multi_reduction <add>, %71, %cst_19 [1] : vector<8x256xf32> to vector<8xf32>
    %73 = vector.shape_cast %72 : vector<8xf32> to vector<8x1xf32>
    %74 = arith.addf %66, %73 : vector<8x1xf32>
    %c1_20 = arith.constant 1 : index
    %c0_21 = arith.constant 0 : index
    %c0_22 = arith.constant 0 : index
    %75 = vector.load %arg4[%c1_20, %c0_21, %c0_22] : memref<2x8x256xf32, #tpu.memory_space<vmem>>, vector<1x8x256xf32>
    %76 = vector.shape_cast %75 : vector<1x8x256xf32> to vector<8x256xf32>
    %77 = vector.broadcast %65 : vector<8x1xf32> to vector<8x256xf32>
    %78 = arith.subf %76, %77 : vector<8x256xf32>
    %79 = arith.mulf %78, %78 : vector<8x256xf32>
    %cst_23 = arith.constant dense<0.000000e+00> : vector<8xf32>
    %80 = vector.multi_reduction <add>, %79, %cst_23 [1] : vector<8x256xf32> to vector<8xf32>
    %81 = vector.shape_cast %80 : vector<8xf32> to vector<8x1xf32>
    %82 = arith.addf %74, %81 : vector<8x1xf32>
    %cst_24 = arith.constant 0.001953125 : f32
    %83 = vector.broadcast %cst_24 : f32 to vector<8x1xf32>
    %84 = arith.mulf %82, %83 : vector<8x1xf32>
    %c0_25 = arith.constant 0 : index
    %c0_26 = arith.constant 0 : index
    %85 = vector.load %arg2[%c0_25, %c0_26] : memref<8x1xf32, #tpu.memory_space<vmem>>, vector<8x1xf32>
    %cst_27 = arith.constant 9.99999974E-6 : f32
    %86 = vector.broadcast %cst_27 : f32 to vector<8x1xf32>
    %87 = arith.addf %84, %86 : vector<8x1xf32>
    %88 = math.rsqrt %87 : vector<8x1xf32>
    %89 = arith.mulf %85, %88 : vector<8x1xf32>
    %c0_28 = arith.constant 0 : index
    %c0_29 = arith.constant 0 : index
    %90 = vector.load %arg3[%c0_28, %c0_29] : memref<8x1xf32, #tpu.memory_space<vmem>>, vector<8x1xf32>
    %91 = arith.mulf %65, %89 : vector<8x1xf32>
    %92 = arith.subf %90, %91 : vector<8x1xf32>
    %c0_30 = arith.constant 0 : index
    %c0_31 = arith.constant 0 : index
    %c0_32 = arith.constant 0 : index
    %93 = vector.load %arg4[%c0_30, %c0_31, %c0_32] : memref<2x8x256xf32, #tpu.memory_space<vmem>>, vector<1x8x256xf32>
    %94 = vector.shape_cast %93 : vector<1x8x256xf32> to vector<8x256xf32>
    %95 = vector.broadcast %89 : vector<8x1xf32> to vector<8x256xf32>
    %96 = arith.mulf %94, %95 : vector<8x256xf32>
    %97 = vector.broadcast %92 : vector<8x1xf32> to vector<8x256xf32>
    %98 = arith.addf %96, %97 : vector<8x256xf32>
    %cst_33 = arith.constant 0.00999999977 : f32
    %99 = vector.broadcast %cst_33 : f32 to vector<8x256xf32>
    %100 = arith.mulf %99, %98 : vector<8x256xf32>
    %101 = arith.maximumf %98, %100 : vector<8x256xf32>
    %c0_34 = arith.constant 0 : index
    %c0_35 = arith.constant 0 : index
    %c0_36 = arith.constant 0 : index
    %102 = vector.load %arg4[%c0_34, %c0_35, %c0_36] : memref<2x8x256xf32, #tpu.memory_space<vmem>>, vector<1x8x256xf32>
    %103 = vector.shape_cast %102 : vector<1x8x256xf32> to vector<8x256xf32>
    %104 = vector.shape_cast %101 : vector<8x256xf32> to vector<1x8x256xf32>
    tpu.vector_store %arg4[%c0_34, %c0_35, %c0_36], %104 {strides = array<i32>} : memref<2x8x256xf32, #tpu.memory_space<vmem>>, vector<1x8x256xf32>,
    %c1_37 = arith.constant 1 : index
    %c0_38 = arith.constant 0 : index
    %c0_39 = arith.constant 0 : index
    %105 = vector.load %arg4[%c1_37, %c0_38, %c0_39] : memref<2x8x256xf32, #tpu.memory_space<vmem>>, vector<1x8x256xf32>
    %106 = vector.shape_cast %105 : vector<1x8x256xf32> to vector<8x256xf32>
    %107 = vector.broadcast %89 : vector<8x1xf32> to vector<8x256xf32>
    %108 = arith.mulf %106, %107 : vector<8x256xf32>
    %109 = vector.broadcast %92 : vector<8x1xf32> to vector<8x256xf32>
    %110 = arith.addf %108, %109 : vector<8x256xf32>
    %cst_40 = arith.constant 0.00999999977 : f32
    %111 = vector.broadcast %cst_40 : f32 to vector<8x256xf32>
    %112 = arith.mulf %111, %110 : vector<8x256xf32>
    %113 = arith.maximumf %110, %112 : vector<8x256xf32>
    %c1_41 = arith.constant 1 : index
    %c0_42 = arith.constant 0 : index
    %c0_43 = arith.constant 0 : index
    %114 = vector.load %arg4[%c1_41, %c0_42, %c0_43] : memref<2x8x256xf32, #tpu.memory_space<vmem>>, vector<1x8x256xf32>
    %115 = vector.shape_cast %114 : vector<1x8x256xf32> to vector<8x256xf32>
    %116 = vector.shape_cast %113 : vector<8x256xf32> to vector<1x8x256xf32>
    tpu.vector_store %arg4[%c1_41, %c0_42, %c0_43], %116 {strides = array<i32>} : memref<2x8x256xf32, #tpu.memory_space<vmem>>, vector<1x8x256xf32>,
    return
  }
}

</mosaic_0001>

<bundles_post_ra>
// kernel: tpu_custom_call.1
= control target key start
LH: loop header
LB: loop body
LE: loop exit
PB: predicated region body
PF: predicated region fallthrough
CT: control target
= control target key end

     0   :  { %v341_v1 = vmov 0   ;;  %v342_v2 = vmov 2   ;;  %s391_s0 = inlined_call_operand.vmem [shape: f32[2,4,256], index: 0, kind: input, shape index: {}]   ;;  %s392_s1 = inlined_call_operand.vmem [shape: f32[8,4], index: 1, kind: input, shape index: {}]   ;;  %s393_s2 = inlined_call_operand.vmem [shape: f32[8,1], index: 2, kind: input, shape index: {}]   ;;  %s394_s3 = inlined_call_operand.vmem [shape: f32[8,1], index: 3, kind: input, shape index: {}]   ;;  %s395_s4 = inlined_call_operand.hbm [shape: f32[2,8,256], index: 4, kind: output, shape index: {}]  }
   0x1   :  { %v18_v0 = vld [vmem:[%s392_s1] sm:$0xff]  ;;  %311 = vset.pattern.permute.xlu0 %v341_v1  ;;  %313 = vset.pattern.permute.xlu1 %v342_v2 }
   0x2   :  { %9 = vsyncpa [#allocation3], 0  ;;  %22 = vperm.xlu0 %311, %v18_v0   ;;  %73 = vperm.xlu1 %313, %v18_v0   ;;  %v343_v3 = vmov 1   ;;  %v344_v4 = vmov 3   ;;  %v26_v5 = vlaneseq  ;;  %v19_v9 = vld [vmem:[%s391_s0] sm:$0xff]  ;;  %v303_v10 = vld [vmem:[%s391_s0 + $0x8] sm:$0xff] }
   0x4   :  { %v27_v6 = vshrl.u32 %v26_v5, 7 }
   0x6   :  { %312 = vset.pattern.permute.xlu0 %v343_v3  ;;  %314 = vset.pattern.permute.xlu1 %v344_v4  ;;  %v28_v7 = vsub.s32 0, %v27_v6  ;;  %v32_v8 = vsub.s32 4, %v27_v6  ;;  %v78_v11 = vsub.s32 2, %v27_v6  ;;  %v82_v12 = vsub.s32 6, %v27_v6 }
   0x7   :  { %47 = vperm.xlu0 %312, %v18_v0   ;;  %99 = vperm.xlu1 %314, %v18_v0   ;;  %v52_v13 = vsub.s32 1, %v27_v6  ;;  %v56_v14 = vsub.s32 5, %v27_v6  ;;  %v104_v15 = vsub.s32 3, %v27_v6  ;;  %v108_v16 = vsub.s32 7, %v27_v6 }
   0x8   :  { %v29_v17 = vrot.slane %v19_v9, %v28_v7  ;;  %v33_v18 = vrot.slane %v19_v9, %v32_v8  ;;  %v136_v19 = vrot.slane %v303_v10, %v28_v7  ;;  %v140_v20 = vrot.slane %v303_v10, %v32_v8 }
   0x9   :  { %v79_v21 = vrot.slane %v19_v9, %v78_v11  ;;  %v83_v22 = vrot.slane %v19_v9, %v82_v12  ;;  %v178_v23 = vrot.slane %v303_v10, %v78_v11  ;;  %v182_v24 = vrot.slane %v303_v10, %v82_v12 }
   0xa   :  { %v53_v25 = vrot.slane %v19_v9, %v52_v13  ;;  %v57_v26 = vrot.slane %v19_v9, %v56_v14  ;;  %v156_v27 = vrot.slane %v303_v10, %v52_v13  ;;  %v160_v28 = vrot.slane %v303_v10, %v56_v14 }
   0xb   :  { %315 = vset.pattern.permute.xlu0 %v341_v1  ;;  %316 = vset.pattern.permute.xlu1 %v341_v1  ;;  %v200_v29 = vrot.slane %v303_v10, %v104_v15  ;;  %v204_v30 = vrot.slane %v303_v10, %v108_v16  ;;  %v105_v31 = vrot.slane %v19_v9, %v104_v15 }
   0xc   :  { %v109_v32 = vrot.slane %v19_v9, %v108_v16  ;;  %v39_v33 = vrot.slane %v29_v17, %v28_v7  ;;  %v43_v34 = vrot.slane %v33_v18, %v28_v7  ;;  %v146_v35 = vrot.slane %v136_v19, %v28_v7 }
   0xd   :  { %v150_v36 = vrot.slane %v140_v20, %v28_v7  ;;  %v89_v39 = vrot.slane %v79_v21, %v78_v11  ;;  %v93_v40 = vrot.slane %v83_v22, %v78_v11  ;;  %v188_v41 = vrot.slane %v178_v23, %v78_v11 }
   0xe   :  { %v192_v42 = vrot.slane %v182_v24, %v78_v11  ;;  %v63_v43 = vrot.slane %v53_v25, %v52_v13  ;;  %v67_v44 = vrot.slane %v57_v26, %v52_v13  ;;  %v166_v45 = vrot.slane %v156_v27, %v52_v13 }
   0xf   :  { %v170_v46 = vrot.slane %v160_v28, %v52_v13  ;;  %v210_v47 = vrot.slane %v200_v29, %v104_v15  ;;  %v214_v48 = vrot.slane %v204_v30, %v104_v15  ;;  %v115_v49 = vrot.slane %v105_v31, %v104_v15 }
  0x10   :  { %v119_v50 = vrot.slane %v109_v32, %v104_v15 }
  0x7d   :  { %v23_v37 = vpop.permute.xlu0 %22  ;;  %v74_v38 = vpop.permute.xlu1 %73 }
  0x7e   :  { %v44_v51 = vmul.f32 %v39_v33, %v23_v37  ;;  %v45_v52 = vmul.f32 %v43_v34, %v23_v37  ;;  %v151_v53 = vmul.f32 %v146_v35, %v23_v37  ;;  %v152_v54 = vmul.f32 %v150_v36, %v23_v37 }
  0x7f   :  { %v94_v55 = vmul.f32 %v89_v39, %v74_v38  ;;  %v95_v56 = vmul.f32 %v93_v40, %v74_v38  ;;  %v193_v57 = vmul.f32 %v188_v41, %v74_v38  ;;  %v194_v58 = vmul.f32 %v192_v42, %v74_v38  ;;  %v248_v38 = vld [vmem:[%s393_s2] sm:$0xff]  ;;  %s345_s2 = smov [#allocation2]  }
  0x80   :  { %v252_v41 = vld [vmem:[%s394_s3] sm:$0xff]  ;;  %s292_s23 = sshll.u32 %s345_s2, 4  ;;  %s293_s23 = int_to_ptr.vmem [resolvable:$true] %s292_s23 }
  0x81   :  { %s319_s3 = scalar_lea.vmem %s293_s23, 512  ;;  %p324_p1 = scmp.lt.s32.totalorder %s293_s23, %s293_s23 }
  0x82   :  { %v48_v59 = vpop.permute.xlu0 %47  ;;  %v100_v60 = vpop.permute.xlu1 %99  ;;  %p320_p0 = scmp.ne.s32.totalorder %s293_s23, %s319_s3  ;;  %p325_p2 = scmp.lt.s32.totalorder %s319_s3, %s319_s3 }
  0x83   :  { %v68_v61 = vmul.f32 %v63_v43, %v48_v59  ;;  %v69_v62 = vmul.f32 %v67_v44, %v48_v59  ;;  %v171_v63 = vmul.f32 %v166_v45, %v48_v59  ;;  %v172_v0 = vmul.f32 %v170_v46, %v48_v59 }
  0x84   :  { %v215_v1 = vmul.f32 %v210_v47, %v100_v60  ;;  %v216_v2 = vmul.f32 %v214_v48, %v100_v60  ;;  %v120_v3 = vmul.f32 %v115_v49, %v100_v60  ;;  %v121_v4 = vmul.f32 %v119_v50, %v100_v60  ;;  %p326_p3 = por %p325_p2, %p324_p1 }
  0x85   :  { %v173_v5 = vadd.f32 %v171_v63, %v151_v53  ;;  %v174_v6 = vadd.f32 %v172_v0, %v152_v54  ;;  %v70_v7 = vadd.f32 %v68_v61, %v44_v51  ;;  %v71_v8 = vadd.f32 %v69_v62, %v45_v52 }
  0x86   :  { %p327_p4 = pnand %p326_p3, %p320_p0 }
  0x87   :  { %v195_v9 = vadd.f32 %v193_v57, %v173_v5  ;;  %v196_v10 = vadd.f32 %v194_v58, %v174_v6  ;;  %v96_v11 = vadd.f32 %v94_v55, %v70_v7  ;;  %v97_v12 = vadd.f32 %v95_v56, %v71_v8 }
  0x89   :  { %v217_v13 = vadd.f32 %v215_v1, %v195_v9  ;;  %v218_v14 = vadd.f32 %v216_v2, %v196_v10  ;;  %v122_v15 = vadd.f32 %v120_v3, %v96_v11  ;;  %v123_v16 = vadd.f32 %v121_v4, %v97_v12 }
  0x8b   :  { %v222_v17 = vadd.f32 %v218_v14, %v217_v13  ;;  %v126_v18 = vadd.f32 %v123_v16, %v122_v15 }
  0x8d   :  { %223 = vadd.xlane.f32.xlu0 %v222_v17  ;;  %127 = vadd.xlane.f32.xlu1 %v126_v18 }
 0x116   :  { %v224_v19 = vpop.xlane.xlu0 %223  ;;  %v128_v20 = vpop.xlane.xlu1 %127 }
 0x117   :  { %v225_v21 = vadd.f32 %v224_v19, %v128_v20 }
 0x119   :  { %v226_v22 = vmul.f32 0.001953125, %v225_v21 }
 0x11b   :  { %v239_v23 = vsub.f32 %v217_v13, %v226_v22  ;;  %v240_v24 = vsub.f32 %v218_v14, %v226_v22  ;;  %v229_v25 = vsub.f32 %v122_v15, %v226_v22  ;;  %v230_v26 = vsub.f32 %v123_v16, %v226_v22 }
 0x11d   :  { %v241_v27 = vmul.f32 %v239_v23, %v239_v23  ;;  %v242_v28 = vmul.f32 %v240_v24, %v240_v24  ;;  %v231_v29 = vmul.f32 %v229_v25, %v229_v25  ;;  %v232_v30 = vmul.f32 %v230_v26, %v230_v26 }
 0x11f   :  { %v243_v31 = vadd.f32 %v242_v28, %v241_v27  ;;  %v233_v32 = vadd.f32 %v232_v30, %v231_v29 }
 0x121   :  { %244 = vadd.xlane.f32.xlu1 %v243_v31  ;;  %234 = vadd.xlane.f32.xlu0 %v233_v32 }
 0x1aa   :  { %v245_v33 = vpop.xlane.xlu1 %244  ;;  %v235_v34 = vpop.xlane.xlu0 %234 }
 0x1ab   :  { %v246_v35 = vadd.f32 %v245_v33, %v235_v34 }
 0x1ad   :  { %v247_v36 = vmul.f32 0.001953125, %v246_v35 }
 0x1af   :  { %v249_v37 = vadd.f32 1e-05, %v247_v36 }
 0x1b1   :  { %317 = vrsqrt.f32 %v249_v37 }
 0x1be   :  { %v318_v39 = vpop.eup %317 }
 0x1bf   :  { %v251_v40 = vmul.f32 %v318_v39, %v248_v38 }
 0x1c1   :  { %257 = vperm.xlu0 %315, %v251_v40   ;;  %v253_v42 = vmul.f32 %v251_v40, %v226_v22 }
 0x1c3   :  { %v254_v43 = vsub.f32 %v252_v41, %v253_v42 }
 0x1c5   :  { %264 = vperm.xlu1 %316, %v254_v43  }
 0x23c   :  { %v258_v44 = vpop.permute.xlu0 %257 }
 0x23d   :  { %v260_v45 = vmul.f32 %v258_v44, %v122_v15  ;;  %v261_v46 = vmul.f32 %v258_v44, %v123_v16  ;;  %v277_v47 = vmul.f32 %v258_v44, %v217_v13  ;;  %v278_v48 = vmul.f32 %v258_v44, %v218_v14 }
 0x240   :  { %v265_v49 = vpop.permute.xlu1 %264 }
 0x241   :  { %v267_v50 = vadd.f32 %v265_v49, %v260_v45  ;;  %v268_v51 = vadd.f32 %v265_v49, %v261_v46  ;;  %v279_v52 = vadd.f32 %v277_v47, %v265_v49  ;;  %v280_v53 = vadd.f32 %v278_v48, %v265_v49 }
 0x243   :  { %v269_v54 = vmul.f32 0.01, %v267_v50  ;;  %v270_v55 = vmul.f32 0.01, %v268_v51  ;;  %v281_v56 = vmul.f32 0.01, %v279_v52 }
 0x244   :  { %v282_v57 = vmul.f32 0.01, %v280_v53 }
 0x245   :  { %v271_v58 = vmax.f32 %v267_v50, %v269_v54  ;;  %v272_v59 = vmax.f32 %v268_v51, %v270_v55  ;;  %v283_v60 = vmax.f32 %v279_v52, %v281_v56 }
 0x246   :  { %v284_v61 = vmax.f32 %v280_v53, %v282_v57 }
 0x247   :  { %273 = vst [vmem:[#allocation2] sm:$0xff] %v271_v58  ;;  %274 = vst [vmem:[#allocation2 + $0x8] sm:$0xff] %v272_v59 }
 0x248   :  { %285 = vst [vmem:[#allocation2 + $0x10] sm:$0xff] %v283_v60  ;;  %286 = vst [vmem:[#allocation2 + $0x18] sm:$0xff] %v284_v61 }
 0x249   :  { %330 = shalt.err (!%p327_p4)
}
 0x24a   :  { %s346_s24 = smov 256   ;;  %s347_s25 = smov 16  }
 0x24b   :  { %298 = dma.vmem_to_hbm [thread:$0]  %s293_s23, 512, %s395_s4, [#allocation3], %s346_s24, %s346_s24, %s347_s25  }
 0x24c   :  { %339 = dma.done.wait [#allocation3], 512  }
 0x24d   :  { %340 = vsyncadd [#allocation3], 4294966784 }
 0x24e   :  { %302 = vsyncpa [#allocation3], 1 }

</bundles_post_ra>
